<compile_context>
chip_gen: v5e
topology: v5e:2x2
jax: 0.10.0
libtpu: 0.0.40
codegen_flags: <defaults>
</compile_context>

<pallas_src>
import jax
import jax.numpy as jnp
from jax import lax
from jax.experimental import pallas as pl
from jax.experimental.pallas import tpu as pltpu

_LANES = 128  # full lane width for the lane-dense output block


def _attention_kernel(hid_ref, enc_ref, w_ref, b_ref, v_ref, o_ref):
    # hid_ref: [B, H]       decoder hidden state
    # enc_ref: [S, B, H]    encoder outputs (seq-first)
    # w_ref  : [H, H]       nn.Linear weight, torch [out, in] layout (NOT transposed)
    # b_ref  : [1, H]       nn.Linear bias
    # v_ref  : [1, H]       attention vector v
    # o_ref  : [N, 128]     lane-padded softmax weights (valid columns [:, :S])
    B, H = hid_ref.shape
    S = enc_ref.shape[0]
    N = B + S
    lanes = o_ref.shape[1]

    # Assemble to_attn in VMEM (no HBM materialization of the concatenated tensor):
    #   rows [0, B*S)      : hidden[b] repeated S times  (== h.transpose(0,1) flattened)
    #   rows [B*S, 2*B*S)  : encoder_outputs flattened over (seq, batch)
    hid = hid_ref[...]                                          # [B, H]
    h3 = jnp.broadcast_to(hid[:, None, :], (B, S, H))           # [B, S, H]
    x = jnp.concatenate([h3, enc_ref[...]], axis=0)             # [N, S, H]
    x = x.reshape(N * S, H)                                     # [N*S, H]  (flat rows)

    # Linear layer as a single flat MXU matmul: contract W's dim 1 (torch
    # [out, in] layout) so y = x @ W^T, with f32 accumulation.
    y = lax.dot_general(
        x, w_ref[...],
        dimension_numbers=(((1,), (1,)), ((), ())),
        preferred_element_type=jnp.float32)                     # [N*S, H]

    energy = jnp.tanh(y + b_ref[...])                           # [N*S, H]
    # scores[n, s] = energy[n, s, :] . v   (VPU multiply + lane reduction;
    # keeps the MXU free instead of an [*,H] x [H,1] matmul)
    scores = jnp.sum(energy.reshape(N, S, H) * v_ref[...], axis=-1)   # [N, S]

    # Softmax over the sequence axis on a full-lane-width block: padded lanes
    # hold -1e30 so exp() underflows to exactly 0 and the final store is a
    # full-width unmasked vector store.
    if lanes > S:
        pad = jnp.full((N, lanes - S), -1e30, dtype=jnp.float32)
        s_pad = jnp.concatenate([scores, pad], axis=1)          # [N, lanes]
    else:
        s_pad = scores
    m = jnp.max(s_pad, axis=1, keepdims=True)
    p = jnp.exp(s_pad - m)
    o_ref[...] = (p / jnp.sum(p, axis=1, keepdims=True)).astype(o_ref.dtype)


def attention_forward(hidden, encoder_outputs, weight, bias, v):
    """hidden: [B, H]; encoder_outputs: [S, B, H]; weight: [H, H] (torch layout
    [out, in]); bias, v: [H].  Returns attention weights [B + S, S]."""
    S, B_enc, H = encoder_outputs.shape
    B, H2 = hidden.shape
    assert H == H2 and B == B_enc
    # cat along dim 0 in the reference only type-checks when seq_len == batch.
    assert B == S, "literal torch.cat(dim=0) in the reference requires B == S"
    N = B + S
    out_w = max(_LANES, ((S + _LANES - 1) // _LANES) * _LANES)

    out_padded = pl.pallas_call(
        _attention_kernel,
        out_shape=jax.ShapeDtypeStruct((N, out_w), jnp.float32),
        in_specs=[pl.BlockSpec(memory_space=pltpu.MemorySpace.VMEM)
                  for _ in range(5)],
        out_specs=pl.BlockSpec(memory_space=pltpu.MemorySpace.VMEM),
    )(hidden, encoder_outputs, weight, bias.reshape(1, H), v.reshape(1, H))
    return out_padded[:, :S]


def _reference(hidden, encoder_outputs, weight, bias, v):
    S, B, H = encoder_outputs.shape
    h = jnp.broadcast_to(hidden[None, :, :], (S, B, H)).transpose(1, 0, 2)
    to_attn = jnp.concatenate([h, encoder_outputs], axis=0)
    energy = jnp.tanh(to_attn @ weight.T + bias)
    return jax.nn.softmax(energy @ v, axis=1)


if __name__ == "__main__":
    H = 32   # hidden_size
    B = 8    # batch
    S = 8    # seq_len (must equal B, see comment above)

    key = jax.random.PRNGKey(0)
    k1, k2, k3, k4, k5 = jax.random.split(key, 5)

    # Deterministic parameter init (mirrors nn.Linear uniform init / torch.rand).
    bound = 1.0 / jnp.sqrt(jnp.float32(H))
    weight = jax.random.uniform(k1, (H, H), jnp.float32, -bound, bound)
    bias   = jax.random.uniform(k2, (H,),   jnp.float32, -bound, bound)
    v      = jax.random.uniform(k3, (H,),   jnp.float32, 0.0, 1.0)

    hidden          = jax.random.normal(k4, (B, H), jnp.float32)
    encoder_outputs = jax.random.normal(k5, (S, B, H), jnp.float32)

    out = attention_forward(hidden, encoder_outputs, weight, bias, v)
    out = jax.block_until_ready(out)

    ref = _reference(hidden, encoder_outputs, weight, bias, v)
    assert out.shape == (B + S, S)
    assert jnp.allclose(out, ref, atol=1e-5, rtol=1e-5), "mismatch vs reference"
    print("KERNEL_OK")
</pallas_src>

<mosaic_0001>
module attributes {stable_mosaic.version = 11 : i64} {
  func.func @_attention_kernel(%arg0: memref<8x32xf32, #tpu.memory_space<vmem>>, %arg1: memref<8x8x32xf32, #tpu.memory_space<vmem>>, %arg2: memref<32x32xf32, #tpu.memory_space<vmem>>, %arg3: memref<1x32xf32, #tpu.memory_space<vmem>>, %arg4: memref<1x32xf32, #tpu.memory_space<vmem>>, %arg5: memref<16x128xf32, #tpu.memory_space<vmem>>) attributes {dimension_semantics = [], scalar_prefetch = 0 : i64, scratch_operands = 0 : i64, tpu.core_type = #tpu.core_type<tc>} {
    %c0 = arith.constant 0 : index
    %c0_0 = arith.constant 0 : index
    %0 = vector.load %arg0[%c0, %c0_0] : memref<8x32xf32, #tpu.memory_space<vmem>>, vector<8x32xf32>
    %1 = vector.shape_cast %0 : vector<8x32xf32> to vector<8x1x32xf32>
    %2 = vector.shape_cast %1 : vector<8x1x32xf32> to vector<8x1x32xf32>
    %3 = vector.broadcast %2 : vector<8x1x32xf32> to vector<8x8x32xf32>
    %c0_1 = arith.constant 0 : index
    %c0_2 = arith.constant 0 : index
    %c0_3 = arith.constant 0 : index
    %4 = vector.load %arg1[%c0_1, %c0_2, %c0_3] : memref<8x8x32xf32, #tpu.memory_space<vmem>>, vector<8x8x32xf32>
    %5 = tpu.concatenate %3, %4 in 0 : vector<8x8x32xf32>, vector<8x8x32xf32> -> vector<16x8x32xf32>
    %6 = vector.shape_cast %5 : vector<16x8x32xf32> to vector<128x32xf32>
    %c0_4 = arith.constant 0 : index
    %c0_5 = arith.constant 0 : index
    %7 = vector.load %arg2[%c0_4, %c0_5] : memref<32x32xf32, #tpu.memory_space<vmem>>, vector<32x32xf32>
    %cst = arith.constant dense<0.000000e+00> : vector<128x32xf32>
    %8 = tpu.matmul %6, %7, %cst {dimension_numbers = #tpu.dot_dimension_numbers<[1], [1], [0], [0], [0, 0, 1, 0], [], []>} : vector<128x32xf32>, vector<32x32xf32>, vector<128x32xf32> -> vector<128x32xf32>
    %c0_6 = arith.constant 0 : index
    %c0_7 = arith.constant 0 : index
    %9 = vector.load %arg3[%c0_6, %c0_7] : memref<1x32xf32, #tpu.memory_space<vmem>>, vector<1x32xf32>
    %10 = vector.broadcast %9 : vector<1x32xf32> to vector<128x32xf32>
    %11 = arith.addf %8, %10 : vector<128x32xf32>
    %12 = math.tanh %11 : vector<128x32xf32>
    %13 = vector.shape_cast %12 : vector<128x32xf32> to vector<16x8x32xf32>
    %c0_8 = arith.constant 0 : index
    %c0_9 = arith.constant 0 : index
    %14 = vector.load %arg4[%c0_8, %c0_9] : memref<1x32xf32, #tpu.memory_space<vmem>>, vector<1x32xf32>
    %15 = vector.shape_cast %14 : vector<1x32xf32> to vector<1x1x32xf32>
    %16 = vector.broadcast %15 : vector<1x1x32xf32> to vector<16x8x32xf32>
    %17 = arith.mulf %13, %16 : vector<16x8x32xf32>
    %cst_10 = arith.constant dense<0.000000e+00> : vector<16x8xf32>
    %18 = vector.multi_reduction <add>, %17, %cst_10 [2] : vector<16x8x32xf32> to vector<16x8xf32>
    %cst_11 = arith.constant -1.000000e+30 : f32
    %19 = vector.broadcast %cst_11 : f32 to vector<16x120xf32>
    %20 = tpu.concatenate %18, %19 in 1 : vector<16x8xf32>, vector<16x120xf32> -> vector<16x128xf32>
    %cst_12 = arith.constant dense<0xFF800000> : vector<16xf32>
    %21 = vector.multi_reduction <maximumf>, %20, %cst_12 [1] : vector<16x128xf32> to vector<16xf32>
    %22 = vector.shape_cast %21 : vector<16xf32> to vector<16x1xf32>
    %23 = vector.broadcast %22 : vector<16x1xf32> to vector<16x128xf32>
    %24 = arith.subf %20, %23 : vector<16x128xf32>
    %25 = math.exp %24 : vector<16x128xf32>
    %cst_13 = arith.constant dense<0.000000e+00> : vector<16xf32>
    %26 = vector.multi_reduction <add>, %25, %cst_13 [1] : vector<16x128xf32> to vector<16xf32>
    %27 = vector.shape_cast %26 : vector<16xf32> to vector<16x1xf32>
    %28 = vector.broadcast %27 : vector<16x1xf32> to vector<16x128xf32>
    %29 = arith.divf %25, %28 : vector<16x128xf32>
    %c0_14 = arith.constant 0 : index
    %c0_15 = arith.constant 0 : index
    %30 = vector.load %arg5[%c0_14, %c0_15] : memref<16x128xf32, #tpu.memory_space<vmem>>, vector<16x128xf32>
    tpu.vector_store %arg5[%c0_14, %c0_15], %29 {strides = array<i32>} : memref<16x128xf32, #tpu.memory_space<vmem>>, vector<16x128xf32>,
    return
  }
}

</mosaic_0001>

<bundles_post_ra>
// kernel: tpu_custom_call.1
= control target key start
LH: loop header
LB: loop body
LE: loop exit
PB: predicated region body
PF: predicated region fallthrough
CT: control target
= control target key end

     0   :  { %10 = vsyncpa [#allocation3], 0  ;;  %s756_s0 = inlined_call_operand.hbm [shape: f32[8,32], index: 0, kind: input, shape index: {}]   ;;  %s757_s1 = inlined_call_operand.hbm [shape: f32[8,8,32], index: 1, kind: input, shape index: {}]   ;;  %s758_s2 = inlined_call_operand.hbm [shape: f32[32,32], index: 2, kind: input, shape index: {}]   ;;  %s759_s3 = inlined_call_operand.vmem [shape: f32[1,32], index: 3, kind: input, shape index: {}]   ;;  %s760_s4 = inlined_call_operand.vmem [shape: f32[1,32], index: 4, kind: input, shape index: {}]   ;;  %s761_s5 = inlined_call_operand.hbm [shape: f32[16,128], index: 5, kind: output, shape index: {}]  }
   0x1   :  { %11 = vsyncpa [#allocation6], 0  ;;  %s28_s20 = sshll.u32 %s757_s1, 4  ;;  %s29_s20 = int_to_ptr.hbm [resolvable:$true] %s28_s20 }
   0x2   :  { %12 = vsyncpa [#allocation4], 0  ;;  %s609_s21 = smov [#allocation5]   ;;  %s18_s25 = sshll.u32 %s756_s0, 4  ;;  %s19_s25 = int_to_ptr.hbm [resolvable:$true] %s18_s25 }
   0x3   :  { %s30_s22 = sshll.u32 %s609_s21, 4  ;;  %s610_s26 = smov 128   ;;  %s31_s22 = int_to_ptr.vmem [resolvable:$true] %s30_s22 }
   0x4   :  { %s611_s27 = smov 8   ;;  %s612_s28 = smov [#allocation2]  }
   0x5   :  { %36 = dma.hbm_to_vmem [thread:$0]  %s29_s20, 1024, %s31_s22, [#allocation6], %s610_s26, %s610_s26, %s611_s27  }
   0x6   :  { %s20_s29 = sshll.u32 %s612_s28, 4  ;;  %s41_s6 = sshll.u32 %s758_s2, 4  ;;  %s21_s29 = int_to_ptr.vmem [resolvable:$true] %s20_s29  ;;  %s42_s6 = int_to_ptr.hbm [resolvable:$true] %s41_s6 }
   0x7   :  { %23 = dma.hbm_to_vmem [thread:$0]  %s19_s25, 128, %s21_s29, [#allocation3]  }
   0x8   :  { %s613_s7 = smov [#allocation7]  }
   0x9   :  { %s43_s8 = sshll.u32 %s613_s7, 4  ;;  %s44_s8 = int_to_ptr.vmem [resolvable:$true] %s43_s8 }
   0xa   :  { %49 = dma.hbm_to_vmem [thread:$0]  %s42_s6, 512, %s44_s8, [#allocation6], %s610_s26, %s610_s26, %s611_s27  }
   0xb   :  { %603 = dma.done.wait [#allocation3], 128  }
   0xc   :  { %604 = vsyncadd [#allocation3], 4294967168 }
   0xd   :  { %605 = dma.done.wait [#allocation6], 1536  }
   0xe   :  { %606 = vsyncadd [#allocation6], 4294965760  ;;  %vm99_vm0 = vcmask 261120   ;;  %v94_v0 = vld [vmem:[#allocation7 + $0x18] sm:$0xff]  ;;  %v93_v1 = vld [vmem:[#allocation7 + $0x10] sm:$0xff]  ;;  %vm335_vm1 = vcmask 1041409  }
   0xf   :  { %427 = vmatpush.xpose.msk.msra.mxu0 %vm99_vm0, %v94_v0  ;;  %448 = vmatpush.xpose.msk.msra.mxu2 %vm99_vm0, %v94_v0  ;;  %v92_v2 = vld [vmem:[#allocation7 + $0x8] sm:$0xff]  ;;  %v66_v3 = vld [vmem:[#allocation2] sm:$0xff]  ;;  %v91_v5 = vld [vmem:[#allocation7] sm:$0xff]  ;;  %vm337_vm2 = vcmask 1042434   ;;  %vm339_vm3 = vcmask 1043459   ;;  %vm341_vm4 = vcmask 1044484  }
  0x10   :  { %449 = vmatpush.xpose.msk.msra.mxu3 %vm99_vm0, %v94_v0  ;;  %447 = vmatpush.xpose.msk.msra.mxu1 %vm99_vm0, %v94_v0  ;;  %v71_v4 = vrot.slane %v66_v3, 4  ;;  %v75_v6 = vperm.slane %v66_v3, 0  ;;  %v83_v7 = vld [vmem:[#allocation5] sm:$0xff]  ;;  %v68_v10 = vrot.slane %v66_v3, 1  ;;  %v72_v11 = vrot.slane %v66_v3, 5  ;;  %v84_v13 = vld [vmem:[#allocation5 + $0x8] sm:$0xff] }
  0x11   :  { %v87_v9 = vld [vmem:[#allocation5 + $0x20] sm:$0xff]  ;;  %v88_v15 = vld [vmem:[#allocation5 + $0x28] sm:$0xff]  ;;  %v69_v16 = vrot.slane %v66_v3, 2  ;;  %v73_v17 = vrot.slane %v66_v3, 6  ;;  %v85_v19 = vld [vmem:[#allocation5 + $0x10] sm:$0xff]  ;;  %v70_v22 = vrot.slane %v66_v3, 3 }
  0x12   :  { %v79_v8 = vperm.slane %v71_v4, 0  ;;  %v76_v12 = vperm.slane %v68_v10, 0  ;;  %v80_v14 = vperm.slane %v72_v11, 0  ;;  %v89_v21 = vld [vmem:[#allocation5 + $0x30] sm:$0xff]  ;;  %v74_v23 = vrot.slane %v66_v3, 7  ;;  %v86_v25 = vld [vmem:[#allocation5 + $0x18] sm:$0xff] }
  0x13   :  { %428 = vmatpush.xpose.msk.msra.mxu0 %vm99_vm0, %v93_v1  ;;  %451 = vmatpush.xpose.msk.msra.mxu2 %vm99_vm0, %v93_v1  ;;  %v77_v18 = vperm.slane %v69_v16, 0  ;;  %v81_v20 = vperm.slane %v73_v17, 0  ;;  %v78_v24 = vperm.slane %v70_v22, 0  ;;  %v90_v27 = vld [vmem:[#allocation5 + $0x38] sm:$0xff]  ;;  %vm343_vm5 = vcmask 1045509   ;;  %s413_s13 = sshll.u32 %s761_s5, 4  ;;  %s414_s13 = int_to_ptr.hbm [resolvable:$true] %s413_s13 }
  0x14   :  { %452 = vmatpush.xpose.msk.msra.mxu3 %vm99_vm0, %v93_v1  ;;  %450 = vmatpush.xpose.msk.msra.mxu1 %vm99_vm0, %v93_v1  ;;  %v82_v26 = vperm.slane %v74_v23, 0  ;;  %v695_v28 = vld [vmem:[%s759_s3] ss:$0 sm:$0xff]  ;;  %vm345_vm6 = vcmask 1046534   ;;  %vm347_vm7 = vcmask 1047559   ;;  %vm358_vm8 = vcmask 64512  }
  0x15   :  { %v702_v34 = vld [vmem:[%s760_s4] ss:$0 sm:$0xff]  ;;  %s614_s3 = smov [#allocation8]  }
  0x16   :  { %s411_s4 = sshll.u32 %s614_s3, 4  ;;  %s412_s4 = int_to_ptr.vmem [resolvable:$true] %s411_s4 }
  0x17   :  { %429 = vmatpush.xpose.msk.msra.mxu0 %vm99_vm0, %v92_v2  ;;  %454 = vmatpush.xpose.msk.msra.mxu2 %vm99_vm0, %v92_v2 }
  0x18   :  { %455 = vmatpush.xpose.msk.msra.mxu3 %vm99_vm0, %v92_v2  ;;  %453 = vmatpush.xpose.msk.msra.mxu1 %vm99_vm0, %v92_v2 }
  0x1b   :  { %430 = vmatpush.xpose.msk.msra.mxu0 %vm99_vm0, %v91_v5  ;;  %457 = vmatpush.xpose.msk.msra.mxu2 %vm99_vm0, %v91_v5 }
  0x1c   :  { %458 = vmatpush.xpose.msk.msra.mxu3 %vm99_vm0, %v91_v5  ;;  %456 = vmatpush.xpose.msk.msra.mxu1 %vm99_vm0, %v91_v5 }
  0x1e   :  { %431 = vmatmul.msk.f32.vlgmr.msra.gmra.mxu0 %vm99_vm0, %v75_v6  ;;  %439 = vmatmul.msk.f32.vlgmr.msra.gmra.mxu2 %vm99_vm0, %v83_v7 }
  0x1f   :  { %443 = vmatmul.msk.f32.vlgmr.msra.gmra.mxu3 %vm99_vm0, %v87_v9  ;;  %435 = vmatmul.msk.f32.vlgmr.msra.gmra.mxu1 %vm99_vm0, %v79_v8 }
  0x26   :  { %440 = vmatmul.msk.f32.gmra.mxu2 %vm99_vm0, %v84_v13  ;;  %432 = vmatmul.msk.f32.gmra.mxu0 %vm99_vm0, %v76_v12 }
  0x27   :  { %444 = vmatmul.msk.f32.gmra.mxu3 %vm99_vm0, %v88_v15  ;;  %436 = vmatmul.msk.f32.gmra.mxu1 %vm99_vm0, %v80_v14 }
  0x2e   :  { %441 = vmatmul.msk.f32.gmra.mxu2 %vm99_vm0, %v85_v19  ;;  %433 = vmatmul.msk.f32.gmra.mxu0 %vm99_vm0, %v77_v18 }
  0x2f   :  { %437 = vmatmul.msk.f32.gmra.mxu1 %vm99_vm0, %v81_v20  ;;  %445 = vmatmul.msk.f32.gmra.mxu3 %vm99_vm0, %v89_v21 }
  0x36   :  { %442 = vmatmul.msk.f32.gmra.mxu2 %vm99_vm0, %v86_v25  ;;  %434 = vmatmul.msk.f32.gmra.mxu0 %vm99_vm0, %v78_v24 }
  0x37   :  { %446 = vmatmul.msk.f32.gmra.mxu3 %vm99_vm0, %v90_v27  ;;  %438 = vmatmul.msk.f32.gmra.mxu1 %vm99_vm0, %v82_v26 }
  0x9b   :  { %v169_v29 = vpop.f32.mrf.mxu0 }
  0x9c   :  { %v170_v30 = vadd.f32 %v695_v28, %v169_v29  ;;  %v181_v31 = vpop.f32.mrf.mxu1 }
  0x9d   :  { %v182_v32 = vadd.f32 %v695_v28, %v181_v31 }
  0x9e   :  { %467 = vtanh.f32 %v170_v30 }
  0x9f   :  { %469 = vtanh.f32 %v182_v32 }
  0xa1   :  { %v193_v33 = vpop.f32.mrf.mxu2 }
  0xa2   :  { %v194_v35 = vadd.f32 %v695_v28, %v193_v33  ;;  %v205_v36 = vpop.f32.mrf.mxu3 }
  0xa3   :  { %v206_v37 = vadd.f32 %v695_v28, %v205_v36  ;;  %v172_v38 = vpop.f32.mrf.mxu0 }
  0xa4   :  { %v468_v39 = vpop.eup %467  ;;  %471 = vtanh.f32 %v194_v35  ;;  %v173_v40 = vadd.f32 %v695_v28, %v172_v38  ;;  %v184_v41 = vpop.f32.mrf.mxu1 }
  0xa5   :  { %v470_v42 = vpop.eup %469  ;;  %473 = vtanh.f32 %v206_v37  ;;  %v237_v43 = vmul.f32 %v468_v39, %v702_v34  ;;  %v185_v44 = vadd.f32 %v695_v28, %v184_v41 }
  0xa6   :  { %v241_v45 = vmul.f32 %v470_v42, %v702_v34 }
  0xa7   :  { %v253_v46 = vsel %vm99_vm0, %v237_v43, 0.0  ;;  %475 = vtanh.f32 %v185_v44 }
  0xa8   :  { %254 = vadd.xlane.f32.xlu0 %v253_v46  ;;  %477 = vtanh.f32 %v173_v40  ;;  %v265_v47 = vsel %vm99_vm0, %v241_v45, 0.0 }
  0xa9   :  { %v196_v48 = vpop.f32.mrf.mxu2  ;;  %266 = vadd.xlane.f32.xlu2 %v265_v47 }
  0xaa   :  { %v472_v49 = vpop.eup %471  ;;  %v197_v50 = vadd.f32 %v695_v28, %v196_v48  ;;  %v208_v51 = vpop.f32.mrf.mxu3 }
  0xab   :  { %v474_v52 = vpop.eup %473  ;;  %v209_v53 = vadd.f32 %v695_v28, %v208_v51  ;;  %v245_v54 = vmul.f32 %v472_v49, %v702_v34  ;;  %v175_v55 = vpop.f32.mrf.mxu0 }
  0xac   :  { %v249_v56 = vmul.f32 %v474_v52, %v702_v34  ;;  %v176_v57 = vadd.f32 %v695_v28, %v175_v55  ;;  %v187_v58 = vpop.f32.mrf.mxu1  ;;  %v317_v55 = vlaneseq }
  0xad   :  { %v476_v59 = vpop.eup %475  ;;  %479 = vtanh.f32 %v209_v53  ;;  %v277_v60 = vsel %vm99_vm0, %v245_v54, 0.0  ;;  %v188_v61 = vadd.f32 %v695_v28, %v187_v58 }
  0xae   :  { %v478_v62 = vpop.eup %477  ;;  %481 = vtanh.f32 %v197_v50  ;;  %278 = vadd.xlane.f32.xlu1 %v277_v60  ;;  %v289_v63 = vsel %vm99_vm0, %v249_v56, 0.0  ;;  %v242_v0 = vmul.f32 %v476_v59, %v702_v34 }
  0xaf   :  { %483 = vtanh.f32 %v176_v57  ;;  %v238_v2 = vmul.f32 %v478_v62, %v702_v34  ;;  %v318_v57 = vand.u32 127, %v317_v55 }
  0xb0   :  { %290 = vadd.xlane.f32.xlu0 %v289_v63  ;;  %485 = vtanh.f32 %v188_v61  ;;  %v268_v5 = vsel %vm99_vm0, %v242_v0, 0.0 }
  0xb1   :  { %v199_v1 = vpop.f32.mrf.mxu2  ;;  %v256_v12 = vsel %vm99_vm0, %v238_v2, 0.0 }
  0xb2   :  { %v211_v3 = vpop.f32.mrf.mxu3  ;;  %v200_v11 = vadd.f32 %v695_v28, %v199_v1 }
  0xb3   :  { %v480_v4 = vpop.eup %479  ;;  %v178_v6 = vpop.f32.mrf.mxu0  ;;  %v212_v21 = vadd.f32 %v695_v28, %v211_v3 }
  0xb4   :  { %v482_v7 = vpop.eup %481  ;;  %v250_v8 = vmul.f32 %v480_v4, %v702_v34  ;;  %v179_v9 = vadd.f32 %v695_v28, %v178_v6  ;;  %v190_v16 = vpop.f32.mrf.mxu1 }
  0xb5   :  { %v484_v10 = vpop.eup %483  ;;  %v246_v18 = vmul.f32 %v482_v7, %v702_v34  ;;  %v191_v23 = vadd.f32 %v695_v28, %v190_v16 }
  0xb6   :  { %v486_v13 = vpop.eup %485  ;;  %269 = vadd.xlane.f32.xlu1 %v268_v5  ;;  %v292_v14 = vsel %vm99_vm0, %v250_v8, 0.0  ;;  %487 = vtanh.f32 %v179_v9  ;;  %v239_v15 = vmul.f32 %v484_v10, %v702_v34 }
  0xb7   :  { %293 = vadd.xlane.f32.xlu2 %v292_v14  ;;  %489 = vtanh.f32 %v200_v11  ;;  %v243_v19 = vmul.f32 %v486_v13, %v702_v34  ;;  %v280_v26 = vsel %vm99_vm0, %v246_v18, 0.0 }
  0xb8   :  { %257 = vadd.xlane.f32.xlu0 %v256_v12  ;;  %v259_v24 = vsel %vm99_vm0, %v239_v15, 0.0 }
  0xb9   :  { %v202_v17 = vpop.f32.mrf.mxu2  ;;  %v271_v27 = vsel %vm99_vm0, %v243_v19, 0.0 }
  0xba   :  { %v203_v20 = vadd.f32 %v695_v28, %v202_v17  ;;  %v214_v22 = vpop.f32.mrf.mxu3 }
  0xbb   :  { %v215_v25 = vadd.f32 %v695_v28, %v214_v22 }
  0xbc   :  { %491 = vtanh.f32 %v203_v20  ;;  %v488_v29 = vpop.eup %487 }
  0xbd   :  { %493 = vtanh.f32 %v212_v21  ;;  %v490_v30 = vpop.eup %489  ;;  %v240_v31 = vmul.f32 %v488_v29, %v702_v34 }
  0xbe   :  { %281 = vadd.xlane.f32.xlu1 %v280_v26  ;;  %495 = vtanh.f32 %v191_v23  ;;  %v247_v33 = vmul.f32 %v490_v30, %v702_v34 }
  0xbf   :  { %260 = vadd.xlane.f32.xlu2 %v259_v24  ;;  %497 = vtanh.f32 %v215_v25  ;;  %v262_v38 = vsel %vm99_vm0, %v240_v31, 0.0 }
  0xc0   :  { %272 = vadd.xlane.f32.xlu0 %v271_v27  ;;  %v283_v40 = vsel %vm99_vm0, %v247_v33, 0.0 }
  0xc2   :  { %v492_v32 = vpop.eup %491 }
  0xc3   :  { %v248_v35 = vmul.f32 %v492_v32, %v702_v34  ;;  %v494_v28 = vpop.eup %493 }
  0xc4   :  { %v496_v36 = vpop.eup %495  ;;  %v251_v42 = vmul.f32 %v494_v28, %v702_v34 }
  0xc5   :  { %v286_v37 = vsel %vm99_vm0, %v248_v35, 0.0  ;;  %v498_v39 = vpop.eup %497  ;;  %v244_v41 = vmul.f32 %v496_v36, %v702_v34 }
  0xc6   :  { %287 = vadd.xlane.f32.xlu1 %v286_v37  ;;  %v252_v43 = vmul.f32 %v498_v39, %v702_v34  ;;  %v295_v45 = vsel %vm99_vm0, %v251_v42, 0.0 }
  0xc7   :  { %284 = vadd.xlane.f32.xlu2 %v283_v40  ;;  %v274_v44 = vsel %vm99_vm0, %v244_v41, 0.0 }
  0xc8   :  { %263 = vadd.xlane.f32.xlu0 %v262_v38  ;;  %v298_v46 = vsel %vm99_vm0, %v252_v43, 0.0 }
  0xce   :  { %296 = vadd.xlane.f32.xlu1 %v295_v45 }
  0xcf   :  { %275 = vadd.xlane.f32.xlu2 %v274_v44 }
  0xd0   :  { %299 = vadd.xlane.f32.xlu0 %v298_v46 }
 0x11b   :  { %v255_v47 = vpop.xlane.xlu0 %254 }
 0x11c   :  { %v267_v48 = vpop.xlane.xlu2 %266  ;;  %v319_v62 = vperm.slane %v255_v47, %v318_v57 }
 0x11d   :  { %v323_v7 = vperm.slane %v267_v48, %v318_v57 }
 0x121   :  { %v279_v49 = vpop.xlane.xlu1 %278 }
 0x122   :  { %v327_v63 = vperm.slane %v279_v49, %v318_v57 }
 0x123   :  { %v291_v50 = vpop.xlane.xlu0 %290 }
 0x124   :  { %v331_v10 = vperm.slane %v291_v50, %v318_v57 }
 0x129   :  { %v270_v51 = vpop.xlane.xlu1 %269 }
 0x12a   :  { %v294_v52 = vpop.xlane.xlu2 %293  ;;  %v324_v13 = vperm.slane %v270_v51, %v318_v57 }
 0x12b   :  { %v258_v53 = vpop.xlane.xlu0 %257  ;;  %v332_v16 = vperm.slane %v294_v52, %v318_v57 }
 0x12c   :  { %v320_v58 = vperm.slane %v258_v53, %v318_v57 }
 0x12e   :  { %v336_v4 = vsel %vm335_vm1, %v320_v58, %v319_v62 }
 0x131   :  { %v282_v54 = vpop.xlane.xlu1 %281 }
 0x132   :  { %v261_v56 = vpop.xlane.xlu2 %260  ;;  %v328_v59 = vperm.slane %v282_v54, %v318_v57 }
 0x133   :  { %v273_v34 = vpop.xlane.xlu0 %272  ;;  %v321_v60 = vperm.slane %v261_v56, %v318_v57 }
 0x134   :  { %v349_v5 = vsel %vm335_vm1, %v328_v59, %v327_v63  ;;  %v325_v19 = vperm.slane %v273_v34, %v318_v57 }
 0x135   :  { %v338_v8 = vsel %vm337_vm2, %v321_v60, %v336_v4 }
 0x139   :  { %v288_v61 = vpop.xlane.xlu1 %287 }
 0x13a   :  { %v330_v0 = vperm.slane %v288_v61, %v318_v57  ;;  %v285_v1 = vpop.xlane.xlu2 %284 }
 0x13b   :  { %v329_v2 = vperm.slane %v285_v1, %v318_v57  ;;  %v264_v3 = vpop.xlane.xlu0 %263 }
 0x13c   :  { %v322_v6 = vperm.slane %v264_v3, %v318_v57 }
 0x13d   :  { %v350_v9 = vsel %vm337_vm2, %v329_v2, %v349_v5 }
 0x13e   :  { %v351_v11 = vsel %vm339_vm3, %v330_v0, %v350_v9  ;;  %v340_v12 = vsel %vm339_vm3, %v322_v6, %v338_v8 }
 0x13f   :  { %v342_v14 = vsel %vm341_vm4, %v323_v7, %v340_v12  ;;  %v352_v15 = vsel %vm341_vm4, %v331_v10, %v351_v11 }
 0x140   :  { %v344_v18 = vsel %vm343_vm5, %v324_v13, %v342_v14  ;;  %v353_v24 = vsel %vm343_vm5, %v332_v16, %v352_v15 }
 0x141   :  { %v297_v17 = vpop.xlane.xlu1 %296  ;;  %v346_v26 = vsel %vm345_vm6, %v325_v19, %v344_v18 }
 0x142   :  { %v333_v20 = vperm.slane %v297_v17, %v318_v57  ;;  %v276_v21 = vpop.xlane.xlu2 %275 }
 0x143   :  { %v326_v22 = vperm.slane %v276_v21, %v318_v57  ;;  %v300_v23 = vpop.xlane.xlu0 %299 }
 0x144   :  { %v334_v25 = vperm.slane %v300_v23, %v318_v57  ;;  %v354_v27 = vsel %vm345_vm6, %v333_v20, %v353_v24 }
 0x145   :  { %v348_v29 = vsel %vm347_vm7, %v326_v22, %v346_v26 }
 0x146   :  { %v359_v30 = vsel %vm358_vm8, %v348_v29, -1e+30  ;;  %v355_v31 = vsel %vm347_vm7, %v334_v25, %v354_v27 }
 0x147   :  { %361 = vmax.xlane.f32.xlu1 %v359_v30  ;;  %v360_v32 = vsel %vm358_vm8, %v355_v31, -1e+30 }
 0x148   :  { %363 = vmax.xlane.f32.xlu2 %v360_v32 }
 0x1ba   :  { %v362_v33 = vpop.xlane.xlu1 %361 }
 0x1bb   :  { %v365_v35 = vsub.f32 %v359_v30, %v362_v33  ;;  %v364_v28 = vpop.xlane.xlu2 %363 }
 0x1bc   :  { %v366_v36 = vsub.f32 %v360_v32, %v364_v28 }
 0x1bd   :  { %v367_v37 = vmul.f32 1.442695, %v365_v35 }
 0x1be   :  { %v369_v38 = vmul.f32 1.442695, %v366_v36 }
 0x1bf   :  { %499 = vpow2.f32 %v367_v37 }
 0x1c0   :  { %501 = vpow2.f32 %v369_v38 }
 0x1c5   :  { %v500_v39 = vpop.eup %499 }
 0x1c6   :  { %v502_v40 = vpop.eup %501  ;;  %371 = vadd.xlane.f32.xlu0 %v500_v39 }
 0x1c7   :  { %373 = vadd.xlane.f32.xlu1 %v502_v40 }
 0x239   :  { %v372_v41 = vpop.xlane.xlu0 %371 }
 0x23a   :  { %503 = vrcp.f32 %v372_v41  ;;  %v374_v42 = vpop.xlane.xlu1 %373  ;;  %v386_v48 = vand.u32 2147483648, %v372_v41  ;;  %v384_v51 = vand.u32 2147483647, %v372_v41  ;;  %vm380_vm11 = vweird.f32 %v372_v41 }
 0x23b   :  { %505 = vrcp.f32 %v374_v42  ;;  %v401_v52 = vand.u32 2147483648, %v374_v42  ;;  %v399_v54 = vand.u32 2147483647, %v374_v42  ;;  %vm395_vm13 = vweird.f32 %v374_v42 }
 0x23c   :  { %v387_v56 = vor.u32 1.1754944e-38, %v386_v48  ;;  %vm385_vm14 = vcmp.eq.f32.partialorder %v384_v51, 8.507059e+37 }
 0x23d   :  { %v402_v58 = vor.u32 1.1754944e-38, %v401_v52  ;;  %vm400_vm0 = vcmp.eq.f32.partialorder %v399_v54, 8.507059e+37 }
 0x240   :  { %v504_v43 = vpop.eup %503 }
 0x241   :  { %v506_v44 = vpop.eup %505  ;;  %v376_v45 = vmul.f32 %v504_v43, %v372_v41  ;;  %vm381_vm9 = vweird.f32 %v504_v43 }
 0x242   :  { %v391_v46 = vmul.f32 %v506_v44, %v374_v42  ;;  %vm396_vm10 = vweird.f32 %v506_v44  ;;  %vm382_vm12 = vmor %vm380_vm11, %vm381_vm9 }
 0x243   :  { %v377_v47 = vsub.f32 1.0, %v376_v45  ;;  %vm397_vm15 = vmor %vm395_vm13, %vm396_vm10 }
 0x244   :  { %v392_v49 = vsub.f32 1.0, %v391_v46 }
 0x245   :  { %v378_v50 = vmul.f32 %v504_v43, %v377_v47 }
 0x246   :  { %v393_v53 = vmul.f32 %v506_v44, %v392_v49 }
 0x247   :  { %v379_v55 = vadd.f32 %v504_v43, %v378_v50 }
 0x248   :  { %v394_v34 = vadd.f32 %v506_v44, %v393_v53 }
 0x249   :  { %v383_v57 = vsel %vm382_vm12, %v504_v43, %v379_v55 }
 0x24a   :  { %v388_v59 = vsel %vm385_vm14, %v387_v56, %v383_v57  ;;  %v398_v60 = vsel %vm397_vm15, %v506_v44, %v394_v34 }
 0x24b   :  { %v403_v61 = vsel %vm400_vm0, %v402_v58, %v398_v60  ;;  %v389_v62 = vmul.f32 %v500_v39, %v388_v59 }
 0x24c   :  { %v404_v63 = vmul.f32 %v502_v40, %v403_v61 }
 0x24d   :  { %405 = vst [vmem:[#allocation8] sm:$0xff] %v389_v62 }
 0x24e   :  { %406 = vst [vmem:[#allocation8 + $0x8] sm:$0xff] %v404_v63 }
 0x24f   :  { %419 = dma.vmem_to_hbm [thread:$0]  %s412_s4, 256, %s414_s13, [#allocation4], %s610_s26, %s610_s26, %s611_s27  }
 0x250   :  { %607 = dma.done.wait [#allocation4], 256  }
 0x251   :  { %608 = vsyncadd [#allocation4], 4294967040 }
 0x252   :  { %424 = vsyncpa [#allocation3], 1 }
 0x253   :  { %425 = vsyncpa [#allocation6], 1 }
 0x254   :  { %426 = vsyncpa [#allocation4], 1 }

</bundles_post_ra>
